<compile_context>
chip_gen: v6e
topology: v6e:2x2x1
jax: 0.10.0
libtpu: 0.0.40
codegen_flags: <defaults>
</compile_context>

<pallas_src>
import jax
import jax.numpy as jnp
from jax.experimental import pallas as pl
from jax.experimental.pallas import tpu as pltpu

# ---- small synthetic config -------------------------------------------------
B, S, H = 2, 8, 32          # batch, seq, hidden
NH, HD = 2, 16              # heads, head dim (NH * HD == H)
FF = 64                     # FFN intermediate size
VOCAB = 50
N_LAYERS = 2
LAYER_IDX = 1               # EmbeddingModel.layer (index into hidden_states tuple)
LN_EPS = 1e-12
BS = B * S
QKV = 3 * NH * HD           # fused projection width (96)

# rows of the packed per-layer small-parameter slab (each row padded to 128 lanes)
NVEC = 8
(V_BQKV, V_BO, V_LN1G, V_LN1B, V_B1, V_B2, V_LN2G, V_LN2B) = range(NVEC)


def _layer_norm(x, g, b):
    mu = jnp.mean(x, axis=-1, keepdims=True)
    var = jnp.mean(jnp.square(x - mu), axis=-1, keepdims=True)
    return (x - mu) * jax.lax.rsqrt(var + LN_EPS) * g + b


def _masked_mean_pool(pool_ref, x2d, m):
    # x2d: (B*S, H) f32, m: (B, S, 1) f32 in {0,1}.  pool_ref: (B, 1, H).
    x = x2d.reshape(B, S, H)                                        # free leading split
    summed = jnp.sum(x * m, axis=1, keepdims=True)                  # (B,1,H)
    length = jnp.maximum(jnp.sum(m, axis=1, keepdims=True), 1.0)    # clamp: no NaN on all-pad rows
    pool_ref[...] = summed * pl.reciprocal(length, approx=True)     # divide on the EUP


# ---- fused encoder + MeanPoolerHead kernel ----------------------------------
def fused_encoder_kernel(x0_ref, maskp_ref, neg_ref,
                         wqkv_ref, wo_ref, w1_ref, w2_ref, vec_ref,
                         hid_ref, pool_ref, act_ref):
    layer = pl.program_id(0)

    # hidden_states[0] = embedding output; make it the resident activation.
    @pl.when(layer == 0)
    def _():
        act_ref[...] = x0_ref[...]

    x2 = act_ref[...]                      # (B*S, H) f32 == hidden_states[layer]

    # MeanPoolerHead on hidden_states[LAYER_IDX]: the resident activation at
    # the *start* of grid step `layer` is exactly hidden_states[layer].
    if LAYER_IDX < N_LAYERS:
        @pl.when(layer == LAYER_IDX)
        def _():
            _masked_mean_pool(pool_ref, x2, maskp_ref[...])

    # --- this layer's weights: VMEM-resident, indexed (no per-step streaming) --
    wqkv = wqkv_ref[layer]                 # (H, 3*NH*HD) bf16, fused QKV
    wo = wo_ref[layer]                     # (NH, HD, H)  bf16, head-major
    w1 = w1_ref[layer]                     # (H, FF)      bf16
    w2 = w2_ref[layer]                     # (FF, H)      bf16
    vecs = vec_ref[layer]                  # (NVEC, 128)  f32 packed small params
    bqkv = vecs[V_BQKV:V_BQKV + 1, :QKV]
    bo   = vecs[V_BO:V_BO + 1, :H]
    ln1g = vecs[V_LN1G:V_LN1G + 1, :H]
    ln1b = vecs[V_LN1B:V_LN1B + 1, :H]
    b1   = vecs[V_B1:V_B1 + 1, :FF]
    b2   = vecs[V_B2:V_B2 + 1, :H]
    ln2g = vecs[V_LN2G:V_LN2G + 1, :H]
    ln2b = vecs[V_LN2B:V_LN2B + 1, :H]

    x_bf = x2.astype(jnp.bfloat16)

    # --- fused QKV projection: one lane-dense (H x 96) MXU matmul -------------
    qkv = jnp.dot(x_bf, wqkv, preferred_element_type=jnp.float32) + bqkv  # (B*S, 96)
    scale = 1.0 / (HD ** 0.5)
    q_all = qkv[:, 0:NH * HD] * scale      # fold 1/sqrt(HD) into q once
    k_all = qkv[:, NH * HD:2 * NH * HD]
    v_all = qkv[:, 2 * NH * HD:3 * NH * HD]

    # attention-mask broadcast hoisted out of the head loop (not CSE'd by JAX)
    neg_b = jnp.broadcast_to(neg_ref[...], (B, S, S))   # (B,1,S) -> (B,S,S)

    # --- multi-head self-attention -------------------------------------------
    attn = jnp.zeros((BS, H), jnp.float32)
    for n in range(NH):                    # static unroll (NH is small)
        # TODO(synk): at larger NH, batch heads into one contraction; a
        # multi-batch-dim dot_general is less reliable to lower, so at NH=2 we
        # keep a static loop over cheap lane slices of the fused projection.
        q = q_all[:, n * HD:(n + 1) * HD].reshape(B, S, HD).astype(jnp.bfloat16)
        k = k_all[:, n * HD:(n + 1) * HD].reshape(B, S, HD).astype(jnp.bfloat16)
        v = v_all[:, n * HD:(n + 1) * HD].reshape(B, S, HD).astype(jnp.bfloat16)
        s = jnp.einsum('bqd,bkd->bqk', q, k,
                       preferred_element_type=jnp.float32) + neg_b
        m = jnp.max(s, axis=-1, keepdims=True)
        e = jnp.exp(s - m)                 # softmax kept in f32
        p = e * pl.reciprocal(jnp.sum(e, axis=-1, keepdims=True), approx=True)
        ctx = jnp.einsum('bqk,bkd->bqd', p.astype(jnp.bfloat16), v,
                         preferred_element_type=jnp.float32)
        # fold this head's context through its W_O slice; accumulate in f32
        attn = attn + jnp.dot(ctx.reshape(BS, HD).astype(jnp.bfloat16), wo[n],
                              preferred_element_type=jnp.float32)
    attn = attn + bo

    h1 = _layer_norm(x2 + attn, ln1g, ln1b)                         # (B*S, H)

    ff = jnp.dot(h1.astype(jnp.bfloat16), w1,
                 preferred_element_type=jnp.float32) + b1           # (B*S, FF)
    # TODO(synk): HF BERT uses the exact (erf) GELU; tanh approximation differs slightly.
    ff = jax.nn.gelu(ff, approximate=True)
    ff = jnp.dot(ff.astype(jnp.bfloat16), w2,
                 preferred_element_type=jnp.float32) + b2           # (B*S, H)

    y = _layer_norm(h1 + ff, ln2g, ln2b)
    act_ref[...] = y                       # carry to the next layer step
    # TODO(synk): H=32 (<128 lanes) makes this a masked store; the suggested
    # lane-dense (B, S*H) layout needs a sublane->lane relayout whose Mosaic
    # reshape support is unreliable at these tiny dims, so the store stays as-is.
    hid_ref[...] = y                       # hidden_states[layer + 1]

    if LAYER_IDX == N_LAYERS:              # pool the final layer's output
        @pl.when(layer == N_LAYERS - 1)
        def _():
            _masked_mean_pool(pool_ref, y, maskp_ref[...])


def encoder_and_pool(x0_2d, mask_f, p):
    """All encoder layers + MeanPoolerHead in one fused pallas_call.

    Grid = (N_LAYERS,): the whole batch is one block per step (no batch grid
    axis -> half the steps on single-TC v5e/v6e); the activation stays resident
    in a VMEM scratch across layer steps; all weights are resident full-array
    blocks (DMA'd once) indexed by `layer` inside the kernel.
    """
    assert 0 <= LAYER_IDX <= N_LAYERS, "pooler layer index out of range"
    maskp = mask_f[:, :, None]                      # (B, S, 1) pooling mask
    neg = ((1.0 - mask_f) * -1e9)[:, None, :]       # (B, 1, S) additive attn mask (hoisted)

    def full(shape):
        return pl.BlockSpec(shape, lambda *_: (0,) * len(shape))

    in_specs = [
        full((BS, H)),                    # x0 (embedding output, flattened)
        full((B, S, 1)),                  # pooling mask
        full((B, 1, S)),                  # additive attention mask
        full((N_LAYERS, H, QKV)),         # fused QKV weight (resident)
        full((N_LAYERS, NH, HD, H)),      # W_O (head-major, resident)
        full((N_LAYERS, H, FF)),          # FFN in
        full((N_LAYERS, FF, H)),          # FFN out
        full((N_LAYERS, NVEC, 128)),      # packed biases / layernorm params (1 slab)
    ]
    out_specs = [
        pl.BlockSpec((None, BS, H), lambda l: (l, 0, 0)),  # per-layer hidden
        pl.BlockSpec((B, 1, H), lambda l: (0, 0, 0)),      # pooled (resident over l)
    ]
    out_shape = [
        jax.ShapeDtypeStruct((N_LAYERS, BS, H), jnp.float32),
        jax.ShapeDtypeStruct((B, 1, H), jnp.float32),
    ]

    hidden, pooled = pl.pallas_call(
        fused_encoder_kernel,
        out_shape=out_shape,
        grid_spec=pltpu.PrefetchScalarGridSpec(
            num_scalar_prefetch=0,
            grid=(N_LAYERS,),              # sequential layer axis only
            in_specs=in_specs,
            out_specs=out_specs,
            scratch_shapes=[pltpu.VMEM((BS, H), jnp.float32)]),
        # TODO(synk): on v7x re-add a "parallel" batch grid axis (2 TCs) and,
        # at real BERT dims, tile the FFN weights / set vmem_limit_bytes for
        # the 64 MiB VMEM; at this toy size everything fits comfortably.
        compiler_params=pltpu.CompilerParams(
            dimension_semantics=("arbitrary",)),
    )(x0_2d, maskp, neg, p['wqkv'], p['wo'], p['w1'], p['w2'], p['vecs'])
    return hidden.reshape(N_LAYERS, B, S, H), pooled[:, 0, :]


# ---- plain-JAX glue ----------------------------------------------------------
def embed(input_ids, segment_ids, p):
    # Embedding gathers + embedding layernorm (kept outside Pallas).
    x = (p['word_emb'][input_ids]
         + p['pos_emb'][None, :S, :]
         + p['type_emb'][segment_ids])
    return _layer_norm(x, p['emb_ln_g'], p['emb_ln_b'])


def init_params(key):
    ks = jax.random.split(key, 8)

    def w(k, shape, dtype=jnp.bfloat16, scale=0.05):
        return (scale * jax.random.normal(k, shape)).astype(dtype)

    def row(vals):
        r = jnp.zeros((128,), jnp.float32)
        return r.at[:vals.shape[0]].set(vals)

    # One lane-aligned slab holding all small per-layer vectors (one resident buffer).
    per_layer = jnp.stack([
        row(jnp.zeros((QKV,), jnp.float32)),   # V_BQKV: fused QKV bias
        row(jnp.zeros((H,), jnp.float32)),     # V_BO
        row(jnp.ones((H,), jnp.float32)),      # V_LN1G
        row(jnp.zeros((H,), jnp.float32)),     # V_LN1B
        row(jnp.zeros((FF,), jnp.float32)),    # V_B1
        row(jnp.zeros((H,), jnp.float32)),     # V_B2
        row(jnp.ones((H,), jnp.float32)),      # V_LN2G
        row(jnp.zeros((H,), jnp.float32)),     # V_LN2B
    ])
    vecs = jnp.tile(per_layer[None], (N_LAYERS, 1, 1))      # (N_LAYERS, NVEC, 128)

    return {
        'word_emb': w(ks[0], (VOCAB, H), jnp.float32),
        'pos_emb': w(ks[1], (S, H), jnp.float32),
        'type_emb': w(ks[2], (2, H), jnp.float32),
        'emb_ln_g': jnp.ones((1, H), jnp.float32),
        'emb_ln_b': jnp.zeros((1, H), jnp.float32),
        # Encoder matmul weights: bf16, stacked on a leading layer axis, kept
        # VMEM-resident (indexed by `layer` inside the kernel).
        'wqkv': w(ks[3], (N_LAYERS, H, QKV)),       # fused Q|K|V, columns (qkv, head, hd)
        'wo': w(ks[4], (N_LAYERS, NH, HD, H)),      # head-major
        'w1': w(ks[5], (N_LAYERS, H, FF)),
        'w2': w(ks[6], (N_LAYERS, FF, H)),
        'vecs': vecs,
    }


@jax.jit
def embedding_model_forward(params, input_ids, segment_ids, input_mask):
    """Mirrors EmbeddingModel.forward with a MeanPoolerHead at layer LAYER_IDX.

    Returns (logits, hidden_states), hidden_states playing the role of
    `encoder_output.other[0]` (embedding output + each layer's output).
    """
    mask_f = input_mask.astype(jnp.float32)
    emb = embed(input_ids, segment_ids, params)                    # (B, S, H)
    layer_hidden, logits = encoder_and_pool(emb.reshape(BS, H), mask_f, params)
    hidden_states = (emb,) + tuple(layer_hidden[l] for l in range(N_LAYERS))
    # TODO(synk): FirstPoolerHead variant would be hidden_states[LAYER_IDX][:, 0, :].
    return logits, hidden_states


if __name__ == "__main__":
    key = jax.random.PRNGKey(0)
    k_param, k_ids = jax.random.split(key)

    params = init_params(k_param)
    input_ids = jax.random.randint(k_ids, (B, S), 0, VOCAB, dtype=jnp.int32)
    segment_ids = jnp.zeros((B, S), dtype=jnp.int32)
    # second example has 3 padded positions
    input_mask = jnp.array([[1] * S, [1] * (S - 3) + [0] * 3], dtype=jnp.int32)

    logits, hidden_states = embedding_model_forward(
        params, input_ids, segment_ids, input_mask)
    jax.block_until_ready(logits)

    assert logits.shape == (B, H)
    assert len(hidden_states) == N_LAYERS + 1
    assert hidden_states[LAYER_IDX].shape == (B, S, H)
    assert bool(jnp.all(jnp.isfinite(logits)))
    print("KERNEL_OK")
</pallas_src>

<mosaic_0001>
module attributes {stable_mosaic.version = 11 : i64} {
  func.func @fused_encoder_kernel(%arg0: i32, %arg1: memref<16x32xf32, #tpu.memory_space<vmem>>, %arg2: memref<2x8x1xf32, #tpu.memory_space<vmem>>, %arg3: memref<2x1x8xf32, #tpu.memory_space<vmem>>, %arg4: memref<2x32x96xbf16, #tpu.memory_space<vmem>>, %arg5: memref<2x2x16x32xbf16, #tpu.memory_space<vmem>>, %arg6: memref<2x32x64xbf16, #tpu.memory_space<vmem>>, %arg7: memref<2x64x32xbf16, #tpu.memory_space<vmem>>, %arg8: memref<2x8x128xf32, #tpu.memory_space<vmem>>, %arg9: memref<1x16x32xf32, #tpu.memory_space<vmem>>, %arg10: memref<2x1x32xf32, #tpu.memory_space<vmem>>, %arg11: memref<16x32xf32, #tpu.memory_space<vmem>>) attributes {dimension_semantics = [#tpu.dimension_semantics<arbitrary>], iteration_bounds = array<i64: 2>, scalar_prefetch = 0 : i64, scratch_operands = 1 : i64, tpu.core_type = #tpu.core_type<tc>, window_params = [{pipeline_mode = #tpu.pipeline_mode<synchronous>, transform_indices = @transform_0, window_bounds = array<i64: 16, 32>}, {pipeline_mode = #tpu.pipeline_mode<synchronous>, transform_indices = @transform_1, window_bounds = array<i64: 2, 8, 1>}, {pipeline_mode = #tpu.pipeline_mode<synchronous>, transform_indices = @transform_2, window_bounds = array<i64: 2, 1, 8>}, {pipeline_mode = #tpu.pipeline_mode<synchronous>, transform_indices = @transform_3, window_bounds = array<i64: 2, 32, 96>}, {pipeline_mode = #tpu.pipeline_mode<synchronous>, transform_indices = @transform_4, window_bounds = array<i64: 2, 2, 16, 32>}, {pipeline_mode = #tpu.pipeline_mode<synchronous>, transform_indices = @transform_5, window_bounds = array<i64: 2, 32, 64>}, {pipeline_mode = #tpu.pipeline_mode<synchronous>, transform_indices = @transform_6, window_bounds = array<i64: 2, 64, 32>}, {pipeline_mode = #tpu.pipeline_mode<synchronous>, transform_indices = @transform_7, window_bounds = array<i64: 2, 8, 128>}, {transform_indices = @transform_8, window_bounds = array<i64: 1, 16, 32>}, {pipeline_mode = #tpu.pipeline_mode<synchronous>, transform_indices = @transform_9, window_bounds = array<i64: 2, 1, 32>}]} {
    %c0_i32 = arith.constant 0 : i32
    %0 = arith.cmpi eq, %arg0, %c0_i32 : i32
    %1 = arith.extui %0 : i1 to i32
    %c0_i32_0 = arith.constant 0 : i32
    %2 = arith.cmpi ne, %1, %c0_i32_0 : i32
    scf.if %2 {
      %c0_50 = arith.constant 0 : index
      %c0_51 = arith.constant 0 : index
      %174 = vector.load %arg1[%c0_50, %c0_51] : memref<16x32xf32, #tpu.memory_space<vmem>>, vector<16x32xf32>
      %c0_52 = arith.constant 0 : index
      %c0_53 = arith.constant 0 : index
      %175 = vector.load %arg11[%c0_52, %c0_53] : memref<16x32xf32, #tpu.memory_space<vmem>>, vector<16x32xf32>
      tpu.vector_store %arg11[%c0_52, %c0_53], %174 {strides = array<i32>} : memref<16x32xf32, #tpu.memory_space<vmem>>, vector<16x32xf32>,
    } else {
    }
    %c0 = arith.constant 0 : index
    %c0_1 = arith.constant 0 : index
    %3 = vector.load %arg11[%c0, %c0_1] : memref<16x32xf32, #tpu.memory_space<vmem>>, vector<16x32xf32>
    %c1_i32 = arith.constant 1 : i32
    %4 = arith.cmpi eq, %arg0, %c1_i32 : i32
    %5 = arith.extui %4 : i1 to i32
    %c0_i32_2 = arith.constant 0 : i32
    %6 = arith.cmpi ne, %5, %c0_i32_2 : i32
    scf.if %6 {
      %c0_50 = arith.constant 0 : index
      %c0_51 = arith.constant 0 : index
      %c0_52 = arith.constant 0 : index
      %174 = vector.load %arg2[%c0_50, %c0_51, %c0_52] : memref<2x8x1xf32, #tpu.memory_space<vmem>>, vector<2x8x1xf32>
      %175 = vector.shape_cast %3 : vector<16x32xf32> to vector<2x8x32xf32>
      %176 = vector.broadcast %174 : vector<2x8x1xf32> to vector<2x8x32xf32>
      %177 = arith.mulf %175, %176 : vector<2x8x32xf32>
      %cst_53 = arith.constant dense<0.000000e+00> : vector<2x32xf32>
      %178 = vector.multi_reduction <add>, %177, %cst_53 [1] : vector<2x8x32xf32> to vector<2x32xf32>
      %179 = vector.shape_cast %178 : vector<2x32xf32> to vector<2x1x32xf32>
      %cst_54 = arith.constant dense<0.000000e+00> : vector<2x1xf32>
      %180 = vector.multi_reduction <add>, %174, %cst_54 [1] : vector<2x8x1xf32> to vector<2x1xf32>
      %181 = vector.shape_cast %180 : vector<2x1xf32> to vector<2x1x1xf32>
      %cst_55 = arith.constant 1.000000e+00 : f32
      %182 = vector.broadcast %cst_55 : f32 to vector<2x1x1xf32>
      %183 = arith.maximumf %181, %182 : vector<2x1x1xf32>
      %184 = tpu.reciprocal %183 {approx = true} : vector<2x1x1xf32> -> vector<2x1x1xf32>
      %185 = vector.broadcast %184 : vector<2x1x1xf32> to vector<2x1x32xf32>
      %186 = arith.mulf %179, %185 : vector<2x1x32xf32>
      %c0_56 = arith.constant 0 : index
      %c0_57 = arith.constant 0 : index
      %c0_58 = arith.constant 0 : index
      %187 = vector.load %arg10[%c0_56, %c0_57, %c0_58] : memref<2x1x32xf32, #tpu.memory_space<vmem>>, vector<2x1x32xf32>
      tpu.vector_store %arg10[%c0_56, %c0_57, %c0_58], %186 {strides = array<i32>} : memref<2x1x32xf32, #tpu.memory_space<vmem>>, vector<2x1x32xf32>,
    } else {
    }
    %7 = arith.index_cast %arg0 : i32 to index
    %c0_3 = arith.constant 0 : index
    %c0_4 = arith.constant 0 : index
    %8 = vector.load %arg4[%7, %c0_3, %c0_4] : memref<2x32x96xbf16, #tpu.memory_space<vmem>>, vector<1x32x96xbf16>
    %9 = vector.shape_cast %8 : vector<1x32x96xbf16> to vector<32x96xbf16>
    %10 = arith.index_cast %arg0 : i32 to index
    %c0_5 = arith.constant 0 : index
    %c0_6 = arith.constant 0 : index
    %c0_7 = arith.constant 0 : index
    %11 = vector.load %arg5[%10, %c0_5, %c0_6, %c0_7] : memref<2x2x16x32xbf16, #tpu.memory_space<vmem>>, vector<1x2x16x32xbf16>
    %12 = vector.shape_cast %11 : vector<1x2x16x32xbf16> to vector<2x16x32xbf16>
    %13 = arith.index_cast %arg0 : i32 to index
    %c0_8 = arith.constant 0 : index
    %c0_9 = arith.constant 0 : index
    %14 = vector.load %arg6[%13, %c0_8, %c0_9] : memref<2x32x64xbf16, #tpu.memory_space<vmem>>, vector<1x32x64xbf16>
    %15 = vector.shape_cast %14 : vector<1x32x64xbf16> to vector<32x64xbf16>
    %16 = arith.index_cast %arg0 : i32 to index
    %c0_10 = arith.constant 0 : index
    %c0_11 = arith.constant 0 : index
    %17 = vector.load %arg7[%16, %c0_10, %c0_11] : memref<2x64x32xbf16, #tpu.memory_space<vmem>>, vector<1x64x32xbf16>
    %18 = vector.shape_cast %17 : vector<1x64x32xbf16> to vector<64x32xbf16>
    %19 = arith.index_cast %arg0 : i32 to index
    %c0_12 = arith.constant 0 : index
    %c0_13 = arith.constant 0 : index
    %20 = vector.load %arg8[%19, %c0_12, %c0_13] : memref<2x8x128xf32, #tpu.memory_space<vmem>>, vector<1x8x128xf32>
    %21 = vector.shape_cast %20 : vector<1x8x128xf32> to vector<8x128xf32>
    %22 = vector.extract_strided_slice %21 {offsets = [0, 0], sizes = [1, 96], strides = [1, 1]} : vector<8x128xf32> to vector<1x96xf32>
    %23 = vector.extract_strided_slice %21 {offsets = [1, 0], sizes = [1, 32], strides = [1, 1]} : vector<8x128xf32> to vector<1x32xf32>
    %24 = vector.extract_strided_slice %21 {offsets = [2, 0], sizes = [1, 32], strides = [1, 1]} : vector<8x128xf32> to vector<1x32xf32>
    %25 = vector.extract_strided_slice %21 {offsets = [3, 0], sizes = [1, 32], strides = [1, 1]} : vector<8x128xf32> to vector<1x32xf32>
    %26 = vector.extract_strided_slice %21 {offsets = [4, 0], sizes = [1, 64], strides = [1, 1]} : vector<8x128xf32> to vector<1x64xf32>
    %27 = vector.extract_strided_slice %21 {offsets = [5, 0], sizes = [1, 32], strides = [1, 1]} : vector<8x128xf32> to vector<1x32xf32>
    %28 = vector.extract_strided_slice %21 {offsets = [6, 0], sizes = [1, 32], strides = [1, 1]} : vector<8x128xf32> to vector<1x32xf32>
    %29 = vector.extract_strided_slice %21 {offsets = [7, 0], sizes = [1, 32], strides = [1, 1]} : vector<8x128xf32> to vector<1x32xf32>
    %30 = arith.truncf %3 : vector<16x32xf32> to vector<16x32xbf16>
    %cst = arith.constant dense<0.000000e+00> : vector<16x96xf32>
    %31 = tpu.matmul %30, %9, %cst {dimension_numbers = #tpu.dot_dimension_numbers<[1], [0], [0], [1], [0, 0, 1, 1], [], []>} : vector<16x32xbf16>, vector<32x96xbf16>, vector<16x96xf32> -> vector<16x96xf32>
    %32 = vector.broadcast %22 : vector<1x96xf32> to vector<16x96xf32>
    %33 = arith.addf %31, %32 : vector<16x96xf32>
    %34 = vector.extract_strided_slice %33 {offsets = [0, 0], sizes = [16, 32], strides = [1, 1]} : vector<16x96xf32> to vector<16x32xf32>
    %cst_14 = arith.constant 2.500000e-01 : f32
    %35 = vector.broadcast %cst_14 : f32 to vector<16x32xf32>
    %36 = arith.mulf %34, %35 : vector<16x32xf32>
    %37 = vector.extract_strided_slice %33 {offsets = [0, 32], sizes = [16, 32], strides = [1, 1]} : vector<16x96xf32> to vector<16x32xf32>
    %38 = vector.extract_strided_slice %33 {offsets = [0, 64], sizes = [16, 32], strides = [1, 1]} : vector<16x96xf32> to vector<16x32xf32>
    %c0_15 = arith.constant 0 : index
    %c0_16 = arith.constant 0 : index
    %c0_17 = arith.constant 0 : index
    %39 = vector.load %arg3[%c0_15, %c0_16, %c0_17] : memref<2x1x8xf32, #tpu.memory_space<vmem>>, vector<2x1x8xf32>
    %40 = vector.shape_cast %39 : vector<2x1x8xf32> to vector<2x1x8xf32>
    %41 = vector.broadcast %40 : vector<2x1x8xf32> to vector<2x8x8xf32>
    %cst_18 = arith.constant 0.000000e+00 : f32
    %42 = vector.broadcast %cst_18 : f32 to vector<16x32xf32>
    %43 = vector.extract_strided_slice %36 {offsets = [0, 0], sizes = [16, 16], strides = [1, 1]} : vector<16x32xf32> to vector<16x16xf32>
    %44 = vector.shape_cast %43 : vector<16x16xf32> to vector<2x8x16xf32>
    %45 = arith.truncf %44 : vector<2x8x16xf32> to vector<2x8x16xbf16>
    %46 = vector.extract_strided_slice %37 {offsets = [0, 0], sizes = [16, 16], strides = [1, 1]} : vector<16x32xf32> to vector<16x16xf32>
    %47 = vector.shape_cast %46 : vector<16x16xf32> to vector<2x8x16xf32>
    %48 = arith.truncf %47 : vector<2x8x16xf32> to vector<2x8x16xbf16>
    %49 = vector.extract_strided_slice %38 {offsets = [0, 0], sizes = [16, 16], strides = [1, 1]} : vector<16x32xf32> to vector<16x16xf32>
    %50 = vector.shape_cast %49 : vector<16x16xf32> to vector<2x8x16xf32>
    %51 = arith.truncf %50 : vector<2x8x16xf32> to vector<2x8x16xbf16>
    "tpu.trace_start"() <{level = 10 : i32, message = "bqd,bkd->bqk"}> : () -> ()
    %cst_19 = arith.constant dense<0.000000e+00> : vector<2x8x8xf32>
    %52 = tpu.matmul %45, %48, %cst_19 {dimension_numbers = #tpu.dot_dimension_numbers<[2], [2], [1], [1], [0, 0, 0, 1, 1, 1], [0], [0]>} : vector<2x8x16xbf16>, vector<2x8x16xbf16>, vector<2x8x8xf32> -> vector<2x8x8xf32>
    "tpu.trace_stop"() : () -> ()
    %53 = arith.addf %52, %41 : vector<2x8x8xf32>
    %cst_20 = arith.constant dense<0xFF800000> : vector<2x8xf32>
    %54 = vector.multi_reduction <maximumf>, %53, %cst_20 [2] : vector<2x8x8xf32> to vector<2x8xf32>
    %55 = vector.shape_cast %54 : vector<2x8xf32> to vector<2x8x1xf32>
    %56 = vector.broadcast %55 : vector<2x8x1xf32> to vector<2x8x8xf32>
    %57 = arith.subf %53, %56 : vector<2x8x8xf32>
    %58 = math.exp %57 : vector<2x8x8xf32>
    %cst_21 = arith.constant dense<0.000000e+00> : vector<2x8xf32>
    %59 = vector.multi_reduction <add>, %58, %cst_21 [2] : vector<2x8x8xf32> to vector<2x8xf32>
    %60 = vector.shape_cast %59 : vector<2x8xf32> to vector<2x8x1xf32>
    %61 = tpu.reciprocal %60 {approx = true} : vector<2x8x1xf32> -> vector<2x8x1xf32>
    %62 = vector.broadcast %61 : vector<2x8x1xf32> to vector<2x8x8xf32>
    %63 = arith.mulf %58, %62 : vector<2x8x8xf32>
    %64 = arith.truncf %63 : vector<2x8x8xf32> to vector<2x8x8xbf16>
    "tpu.trace_start"() <{level = 10 : i32, message = "bqk,bkd->bqd"}> : () -> ()
    %cst_22 = arith.constant dense<0.000000e+00> : vector<2x8x16xf32>
    %65 = tpu.matmul %64, %51, %cst_22 {dimension_numbers = #tpu.dot_dimension_numbers<[2], [1], [1], [2], [0, 0, 0, 1, 1, 2], [0], [0]>} : vector<2x8x8xbf16>, vector<2x8x16xbf16>, vector<2x8x16xf32> -> vector<2x8x16xf32>
    "tpu.trace_stop"() : () -> ()
    %66 = vector.shape_cast %65 : vector<2x8x16xf32> to vector<16x16xf32>
    %67 = arith.truncf %66 : vector<16x16xf32> to vector<16x16xbf16>
    %68 = vector.extract_strided_slice %12 {offsets = [0, 0, 0], sizes = [1, 16, 32], strides = [1, 1, 1]} : vector<2x16x32xbf16> to vector<1x16x32xbf16>
    %69 = vector.shape_cast %68 : vector<1x16x32xbf16> to vector<16x32xbf16>
    %cst_23 = arith.constant dense<0.000000e+00> : vector<16x32xf32>
    %70 = tpu.matmul %67, %69, %cst_23 {dimension_numbers = #tpu.dot_dimension_numbers<[1], [0], [0], [1], [0, 0, 1, 1], [], []>} : vector<16x16xbf16>, vector<16x32xbf16>, vector<16x32xf32> -> vector<16x32xf32>
    %71 = arith.addf %42, %70 : vector<16x32xf32>
    %72 = vector.extract_strided_slice %36 {offsets = [0, 16], sizes = [16, 16], strides = [1, 1]} : vector<16x32xf32> to vector<16x16xf32>
    %73 = vector.shape_cast %72 : vector<16x16xf32> to vector<2x8x16xf32>
    %74 = arith.truncf %73 : vector<2x8x16xf32> to vector<2x8x16xbf16>
    %75 = vector.extract_strided_slice %37 {offsets = [0, 16], sizes = [16, 16], strides = [1, 1]} : vector<16x32xf32> to vector<16x16xf32>
    %76 = vector.shape_cast %75 : vector<16x16xf32> to vector<2x8x16xf32>
    %77 = arith.truncf %76 : vector<2x8x16xf32> to vector<2x8x16xbf16>
    %78 = vector.extract_strided_slice %38 {offsets = [0, 16], sizes = [16, 16], strides = [1, 1]} : vector<16x32xf32> to vector<16x16xf32>
    %79 = vector.shape_cast %78 : vector<16x16xf32> to vector<2x8x16xf32>
    %80 = arith.truncf %79 : vector<2x8x16xf32> to vector<2x8x16xbf16>
    "tpu.trace_start"() <{level = 10 : i32, message = "bqd,bkd->bqk"}> : () -> ()
    %cst_24 = arith.constant dense<0.000000e+00> : vector<2x8x8xf32>
    %81 = tpu.matmul %74, %77, %cst_24 {dimension_numbers = #tpu.dot_dimension_numbers<[2], [2], [1], [1], [0, 0, 0, 1, 1, 1], [0], [0]>} : vector<2x8x16xbf16>, vector<2x8x16xbf16>, vector<2x8x8xf32> -> vector<2x8x8xf32>
    "tpu.trace_stop"() : () -> ()
    %82 = arith.addf %81, %41 : vector<2x8x8xf32>
    %cst_25 = arith.constant dense<0xFF800000> : vector<2x8xf32>
    %83 = vector.multi_reduction <maximumf>, %82, %cst_25 [2] : vector<2x8x8xf32> to vector<2x8xf32>
    %84 = vector.shape_cast %83 : vector<2x8xf32> to vector<2x8x1xf32>
    %85 = vector.broadcast %84 : vector<2x8x1xf32> to vector<2x8x8xf32>
    %86 = arith.subf %82, %85 : vector<2x8x8xf32>
    %87 = math.exp %86 : vector<2x8x8xf32>
    %cst_26 = arith.constant dense<0.000000e+00> : vector<2x8xf32>
    %88 = vector.multi_reduction <add>, %87, %cst_26 [2] : vector<2x8x8xf32> to vector<2x8xf32>
    %89 = vector.shape_cast %88 : vector<2x8xf32> to vector<2x8x1xf32>
    %90 = tpu.reciprocal %89 {approx = true} : vector<2x8x1xf32> -> vector<2x8x1xf32>
    %91 = vector.broadcast %90 : vector<2x8x1xf32> to vector<2x8x8xf32>
    %92 = arith.mulf %87, %91 : vector<2x8x8xf32>
    %93 = arith.truncf %92 : vector<2x8x8xf32> to vector<2x8x8xbf16>
    "tpu.trace_start"() <{level = 10 : i32, message = "bqk,bkd->bqd"}> : () -> ()
    %cst_27 = arith.constant dense<0.000000e+00> : vector<2x8x16xf32>
    %94 = tpu.matmul %93, %80, %cst_27 {dimension_numbers = #tpu.dot_dimension_numbers<[2], [1], [1], [2], [0, 0, 0, 1, 1, 2], [0], [0]>} : vector<2x8x8xbf16>, vector<2x8x16xbf16>, vector<2x8x16xf32> -> vector<2x8x16xf32>
    "tpu.trace_stop"() : () -> ()
    %95 = vector.shape_cast %94 : vector<2x8x16xf32> to vector<16x16xf32>
    %96 = arith.truncf %95 : vector<16x16xf32> to vector<16x16xbf16>
    %97 = vector.extract_strided_slice %12 {offsets = [1, 0, 0], sizes = [1, 16, 32], strides = [1, 1, 1]} : vector<2x16x32xbf16> to vector<1x16x32xbf16>
    %98 = vector.shape_cast %97 : vector<1x16x32xbf16> to vector<16x32xbf16>
    %cst_28 = arith.constant dense<0.000000e+00> : vector<16x32xf32>
    %99 = tpu.matmul %96, %98, %cst_28 {dimension_numbers = #tpu.dot_dimension_numbers<[1], [0], [0], [1], [0, 0, 1, 1], [], []>} : vector<16x16xbf16>, vector<16x32xbf16>, vector<16x32xf32> -> vector<16x32xf32>
    %100 = arith.addf %71, %99 : vector<16x32xf32>
    %101 = vector.broadcast %23 : vector<1x32xf32> to vector<16x32xf32>
    %102 = arith.addf %100, %101 : vector<16x32xf32>
    %103 = arith.addf %3, %102 : vector<16x32xf32>
    %cst_29 = arith.constant dense<0.000000e+00> : vector<16xf32>
    %104 = vector.multi_reduction <add>, %103, %cst_29 [1] : vector<16x32xf32> to vector<16xf32>
    %105 = vector.shape_cast %104 : vector<16xf32> to vector<16x1xf32>
    %cst_30 = arith.constant 3.200000e+01 : f32
    %106 = vector.broadcast %cst_30 : f32 to vector<16x1xf32>
    %107 = arith.divf %105, %106 : vector<16x1xf32>
    %108 = vector.broadcast %107 : vector<16x1xf32> to vector<16x32xf32>
    %109 = arith.subf %103, %108 : vector<16x32xf32>
    %110 = arith.mulf %109, %109 : vector<16x32xf32>
    %cst_31 = arith.constant dense<0.000000e+00> : vector<16xf32>
    %111 = vector.multi_reduction <add>, %110, %cst_31 [1] : vector<16x32xf32> to vector<16xf32>
    %112 = vector.shape_cast %111 : vector<16xf32> to vector<16x1xf32>
    %cst_32 = arith.constant 3.200000e+01 : f32
    %113 = vector.broadcast %cst_32 : f32 to vector<16x1xf32>
    %114 = arith.divf %112, %113 : vector<16x1xf32>
    %115 = vector.broadcast %107 : vector<16x1xf32> to vector<16x32xf32>
    %116 = arith.subf %103, %115 : vector<16x32xf32>
    %cst_33 = arith.constant 9.99999996E-13 : f32
    %117 = vector.broadcast %cst_33 : f32 to vector<16x1xf32>
    %118 = arith.addf %114, %117 : vector<16x1xf32>
    %119 = math.rsqrt %118 : vector<16x1xf32>
    %120 = vector.broadcast %119 : vector<16x1xf32> to vector<16x32xf32>
    %121 = arith.mulf %116, %120 : vector<16x32xf32>
    %122 = vector.broadcast %24 : vector<1x32xf32> to vector<16x32xf32>
    %123 = arith.mulf %121, %122 : vector<16x32xf32>
    %124 = vector.broadcast %25 : vector<1x32xf32> to vector<16x32xf32>
    %125 = arith.addf %123, %124 : vector<16x32xf32>
    %126 = arith.truncf %125 : vector<16x32xf32> to vector<16x32xbf16>
    %cst_34 = arith.constant dense<0.000000e+00> : vector<16x64xf32>
    %127 = tpu.matmul %126, %15, %cst_34 {dimension_numbers = #tpu.dot_dimension_numbers<[1], [0], [0], [1], [0, 0, 1, 1], [], []>} : vector<16x32xbf16>, vector<32x64xbf16>, vector<16x64xf32> -> vector<16x64xf32>
    %128 = vector.broadcast %26 : vector<1x64xf32> to vector<16x64xf32>
    %129 = arith.addf %127, %128 : vector<16x64xf32>
    %130 = arith.mulf %129, %129 : vector<16x64xf32>
    %131 = arith.mulf %129, %130 : vector<16x64xf32>
    %cst_35 = arith.constant 4.471500e-02 : f32
    %132 = vector.broadcast %cst_35 : f32 to vector<16x64xf32>
    %133 = arith.mulf %132, %131 : vector<16x64xf32>
    %134 = arith.addf %129, %133 : vector<16x64xf32>
    %cst_36 = arith.constant 0.797884583 : f32
    %135 = vector.broadcast %cst_36 : f32 to vector<16x64xf32>
    %136 = arith.mulf %135, %134 : vector<16x64xf32>
    %137 = math.tanh %136 : vector<16x64xf32>
    %cst_37 = arith.constant 1.000000e+00 : f32
    %138 = vector.broadcast %cst_37 : f32 to vector<16x64xf32>
    %139 = arith.addf %138, %137 : vector<16x64xf32>
    %cst_38 = arith.constant 5.000000e-01 : f32
    %140 = vector.broadcast %cst_38 : f32 to vector<16x64xf32>
    %141 = arith.mulf %140, %139 : vector<16x64xf32>
    %142 = arith.mulf %129, %141 : vector<16x64xf32>
    %143 = arith.truncf %142 : vector<16x64xf32> to vector<16x64xbf16>
    %cst_39 = arith.constant dense<0.000000e+00> : vector<16x32xf32>
    %144 = tpu.matmul %143, %18, %cst_39 {dimension_numbers = #tpu.dot_dimension_numbers<[1], [0], [0], [1], [0, 0, 1, 1], [], []>} : vector<16x64xbf16>, vector<64x32xbf16>, vector<16x32xf32> -> vector<16x32xf32>
    %145 = vector.broadcast %27 : vector<1x32xf32> to vector<16x32xf32>
    %146 = arith.addf %144, %145 : vector<16x32xf32>
    %147 = arith.addf %125, %146 : vector<16x32xf32>
    %cst_40 = arith.constant dense<0.000000e+00> : vector<16xf32>
    %148 = vector.multi_reduction <add>, %147, %cst_40 [1] : vector<16x32xf32> to vector<16xf32>
    %149 = vector.shape_cast %148 : vector<16xf32> to vector<16x1xf32>
    %cst_41 = arith.constant 3.200000e+01 : f32
    %150 = vector.broadcast %cst_41 : f32 to vector<16x1xf32>
    %151 = arith.divf %149, %150 : vector<16x1xf32>
    %152 = vector.broadcast %151 : vector<16x1xf32> to vector<16x32xf32>
    %153 = arith.subf %147, %152 : vector<16x32xf32>
    %154 = arith.mulf %153, %153 : vector<16x32xf32>
    %cst_42 = arith.constant dense<0.000000e+00> : vector<16xf32>
    %155 = vector.multi_reduction <add>, %154, %cst_42 [1] : vector<16x32xf32> to vector<16xf32>
    %156 = vector.shape_cast %155 : vector<16xf32> to vector<16x1xf32>
    %cst_43 = arith.constant 3.200000e+01 : f32
    %157 = vector.broadcast %cst_43 : f32 to vector<16x1xf32>
    %158 = arith.divf %156, %157 : vector<16x1xf32>
    %159 = vector.broadcast %151 : vector<16x1xf32> to vector<16x32xf32>
    %160 = arith.subf %147, %159 : vector<16x32xf32>
    %cst_44 = arith.constant 9.99999996E-13 : f32
    %161 = vector.broadcast %cst_44 : f32 to vector<16x1xf32>
    %162 = arith.addf %158, %161 : vector<16x1xf32>
    %163 = math.rsqrt %162 : vector<16x1xf32>
    %164 = vector.broadcast %163 : vector<16x1xf32> to vector<16x32xf32>
    %165 = arith.mulf %160, %164 : vector<16x32xf32>
    %166 = vector.broadcast %28 : vector<1x32xf32> to vector<16x32xf32>
    %167 = arith.mulf %165, %166 : vector<16x32xf32>
    %168 = vector.broadcast %29 : vector<1x32xf32> to vector<16x32xf32>
    %169 = arith.addf %167, %168 : vector<16x32xf32>
    %c0_45 = arith.constant 0 : index
    %c0_46 = arith.constant 0 : index
    %170 = vector.load %arg11[%c0_45, %c0_46] : memref<16x32xf32, #tpu.memory_space<vmem>>, vector<16x32xf32>
    tpu.vector_store %arg11[%c0_45, %c0_46], %169 {strides = array<i32>} : memref<16x32xf32, #tpu.memory_space<vmem>>, vector<16x32xf32>,
    %c0_47 = arith.constant 0 : index
    %c0_48 = arith.constant 0 : index
    %c0_49 = arith.constant 0 : index
    %171 = vector.load %arg9[%c0_47, %c0_48, %c0_49] : memref<1x16x32xf32, #tpu.memory_space<vmem>>, vector<1x16x32xf32>
    %172 = vector.shape_cast %171 : vector<1x16x32xf32> to vector<16x32xf32>
    %173 = vector.shape_cast %169 : vector<16x32xf32> to vector<1x16x32xf32>
    tpu.vector_store %arg9[%c0_47, %c0_48, %c0_49], %173 {strides = array<i32>} : memref<1x16x32xf32, #tpu.memory_space<vmem>>, vector<1x16x32xf32>,
    return
  }
  func.func @transform_0(%arg0: i32) -> (i32, i32) {
    %c0_i32 = arith.constant 0 : i32
    %c0_i32_0 = arith.constant 0 : i32
    %c0_i32_1 = arith.constant 0 : i32
    return %c0_i32, %c0_i32_0 : i32, i32
  }
  func.func @transform_1(%arg0: i32) -> (i32, i32, i32) {
    %c0_i32 = arith.constant 0 : i32
    %c0_i32_0 = arith.constant 0 : i32
    %c0_i32_1 = arith.constant 0 : i32
    %c0_i32_2 = arith.constant 0 : i32
    return %c0_i32, %c0_i32_0, %c0_i32_1 : i32, i32, i32
  }
  func.func @transform_2(%arg0: i32) -> (i32, i32, i32) {
    %c0_i32 = arith.constant 0 : i32
    %c0_i32_0 = arith.constant 0 : i32
    %c0_i32_1 = arith.constant 0 : i32
    %c0_i32_2 = arith.constant 0 : i32
    return %c0_i32, %c0_i32_0, %c0_i32_1 : i32, i32, i32
  }
  func.func @transform_3(%arg0: i32) -> (i32, i32, i32) {
    %c0_i32 = arith.constant 0 : i32
    %c0_i32_0 = arith.constant 0 : i32
    %c0_i32_1 = arith.constant 0 : i32
    %c0_i32_2 = arith.constant 0 : i32
    return %c0_i32, %c0_i32_0, %c0_i32_1 : i32, i32, i32
  }
  func.func @transform_4(%arg0: i32) -> (i32, i32, i32, i32) {
    %c0_i32 = arith.constant 0 : i32
    %c0_i32_0 = arith.constant 0 : i32
    %c0_i32_1 = arith.constant 0 : i32
    %c0_i32_2 = arith.constant 0 : i32
    %c0_i32_3 = arith.constant 0 : i32
    return %c0_i32, %c0_i32_0, %c0_i32_1, %c0_i32_2 : i32, i32, i32, i32
  }
  func.func @transform_5(%arg0: i32) -> (i32, i32, i32) {
    %c0_i32 = arith.constant 0 : i32
    %c0_i32_0 = arith.constant 0 : i32
    %c0_i32_1 = arith.constant 0 : i32
    %c0_i32_2 = arith.constant 0 : i32
    return %c0_i32, %c0_i32_0, %c0_i32_1 : i32, i32, i32
  }
  func.func @transform_6(%arg0: i32) -> (i32, i32, i32) {
    %c0_i32 = arith.constant 0 : i32
    %c0_i32_0 = arith.constant 0 : i32
    %c0_i32_1 = arith.constant 0 : i32
    %c0_i32_2 = arith.constant 0 : i32
    return %c0_i32, %c0_i32_0, %c0_i32_1 : i32, i32, i32
  }
  func.func @transform_7(%arg0: i32) -> (i32, i32, i32) {
    %c0_i32 = arith.constant 0 : i32
    %c0_i32_0 = arith.constant 0 : i32
    %c0_i32_1 = arith.constant 0 : i32
    %c0_i32_2 = arith.constant 0 : i32
    return %c0_i32, %c0_i32_0, %c0_i32_1 : i32, i32, i32
  }
  func.func @transform_8(%arg0: i32) -> (i32, i32, i32) {
    %c0_i32 = arith.constant 0 : i32
    %c0_i32_0 = arith.constant 0 : i32
    %c0_i32_1 = arith.constant 0 : i32
    return %arg0, %c0_i32, %c0_i32_0 : i32, i32, i32
  }
  func.func @transform_9(%arg0: i32) -> (i32, i32, i32) {
    %c0_i32 = arith.constant 0 : i32
    %c0_i32_0 = arith.constant 0 : i32
    %c0_i32_1 = arith.constant 0 : i32
    %c0_i32_2 = arith.constant 0 : i32
    return %c0_i32, %c0_i32_0, %c0_i32_1 : i32, i32, i32
  }
}

</mosaic_0001>

<bundles_post_ra>
// kernel: embedding_model_forward.1
= control target key start
LH: loop header
LB: loop body
LE: loop exit
PB: predicated region body
PF: predicated region fallthrough
CT: control target
= control target key end

     0   :  { %15 = vsyncpa [#allocation4], 0  ;;  %s1706_s30 = smov 0   ;;  %s1926_s0 = inlined_call_operand.vmem [shape: f32[16,32], index: 0, kind: input, shape index: {}]   ;;  %s1927_s1 = inlined_call_operand.vmem [shape: f32[2,8,1], index: 1, kind: input, shape index: {}]   ;;  %s1928_s2 = inlined_call_operand.vmem [shape: f32[2,1,8], index: 2, kind: input, shape index: {}]   ;;  %s1929_s3 = inlined_call_operand.vmem [shape: bf16[2,32,96], index: 3, kind: input, shape index: {}]   ;;  %s1930_s4 = inlined_call_operand.vmem [shape: bf16[2,2,16,32], index: 4, kind: input, shape index: {}]   ;;  %s1931_s5 = inlined_call_operand.vmem [shape: bf16[2,32,64], index: 5, kind: input, shape index: {}]   ;;  %s1932_s6 = inlined_call_operand.vmem [shape: bf16[2,64,32], index: 6, kind: input, shape index: {}]   ;;  %s1933_s7 = inlined_call_operand.vmem [shape: f32[2,8,128], index: 7, kind: input, shape index: {}]   ;;  %s1934_s8 = inlined_call_operand.vmem [shape: f32[2,16,32], index: 8, kind: output, shape index: {0}]   ;;  %s1935_s9 = inlined_call_operand.hbm [shape: f32[2,1,32], index: 9, kind: output, shape index: {1}]  }
   0x1 LB: > { %s1712_s10 = sadd.s32 4294967295, %s1643_s30   ;;  %p1376_p0 = scmp.ge.s32.totalorder %s1643_s30, 1  ;;  %s1643_s30 = sphi %s1706_s30, %s21_s30  }
   0x2   : > { %p276_p1 = scmp.lt.s32.totalorder %s1643_s30, 3 }
   0x4   : > { %p277_p2 = pnand %p1376_p0, %p276_p1 }
   0x5   : > { %p307_p3 = scmp.lt.s32.totalorder (!%p277_p2), %s1712_s10, 1  ;;  %p1379_p4 = scmp.ne.s32.totalorder (!%p277_p2), %s1712_s10, 0 }
   0x6   : > { %280 = sbr.rel (%p277_p2) target bundleno = 2998 (0xbb6), region = 52 }
   0xb   : > { %s308_s11 = scalar_select %p307_p3, %s1712_s10, 1 }
   0xc   : > { %316 = sbr.rel (%p1379_p4) target bundleno = 19 (0x13), region = 56 }
   0xd   : > { %s1416_s12 = sshll.u32 %s308_s11, 4 }
   0xe   : > { %s1721_s15 = scalar_lea.vmem %s1934_s8, %s1416_s12 }
  0x11   : > { %v317_v0 = vld [vmem:[%s1926_s0] sm:$0xff]  ;;  %vm319_vm0 = vcmask 261120   ;;  %v318_v1 = vld [vmem:[%s1926_s0 + $0x8] sm:$0xff] }
  0x12   : > { %320 = vst.msk [vmem:[#allocation2] sm:$0xff] %vm319_vm0, %v317_v0  ;;  %321 = vst.msk [vmem:[#allocation2 + $0x8] sm:$0xff] %vm319_vm0, %v318_v1 }
  0x13 PF: > { %p1380_p5 = scmp.ne.s32.totalorder %s1712_s10, 1 }
  0x15   : > { %327 = sbr.rel (%p1380_p5) target bundleno = 187 (0xbb), region = 60 }
  0x19   : > { %v1730_v2 = vld [vmem:[#allocation2] sm:$0xff]  ;;  %v1732_v3 = vld [vmem:[#allocation2 + $0x8] sm:$0xff] }
  0x1a   : > { %v328_v4 = vld [vmem:[%s1927_s1] sm:$0xff]  ;;  %vm357_vm1 = vcmask 7168   ;;  %v329_v5 = vld [vmem:[%s1927_s1 + $0x8] sm:$0xff]  ;;  %v1645_v6 = vmov 0   ;;  %vm342_vm2 = vcmask 261120   ;;  %vm388_vm3 = vcmask 253952  }
  0x1b   : > { %1565 = vset.pattern.permute.xlu0 %v1645_v6  ;;  %v358_v7 = vsel %vm357_vm1, %v328_v4, 0.0  ;;  %v365_v8 = vsel %vm357_vm1, %v329_v5, 0.0  ;;  %1566 = vset.pattern.permute.xlu1 %v1645_v6 }
  0x1c   : > { %332 = vperm.xlu0 %1565, %v328_v4   ;;  %v359_v9 = vrot.slane %v358_v7, 4  ;;  %v366_v10 = vrot.slane %v365_v8, 4 }
  0x1e   : > { %v360_v11 = vadd.f32 %v359_v9, %v358_v7  ;;  %v367_v12 = vadd.f32 %v366_v10, %v365_v8 }
  0x20   : > { %v361_v13 = vrot.slane %v360_v11, 2  ;;  %v368_v14 = vrot.slane %v367_v12, 2  ;;  %337 = vperm.xlu0 %1565, %v329_v5  }
  0x22   : > { %v362_v15 = vadd.f32 %v361_v13, %v360_v11  ;;  %v369_v16 = vadd.f32 %v368_v14, %v367_v12 }
  0x24   : > { %v363_v17 = vrot.slane %v362_v15, 1  ;;  %v370_v18 = vrot.slane %v369_v16, 1 }
  0x26   : > { %v364_v19 = vadd.f32 %v363_v17, %v362_v15  ;;  %v371_v20 = vadd.f32 %v370_v18, %v369_v16 }
  0x28   : > { %v372_v21 = vmax.f32 %v364_v19, 1.0  ;;  %v373_v22 = vmax.f32 %v371_v20, 1.0 }
  0x2a   : > { %1567 = vrcp.f32 %v372_v21 }
  0x2b   : > { %1569 = vrcp.f32 %v373_v22 }
  0x37   : > { %v1568_v23 = vpop.eup %1567 }
  0x38   : > { %378 = vperm.xlu1 %1566, %v1568_v23   ;;  %v1570_v24 = vpop.eup %1569 }
  0x3c   : > { %383 = vperm.xlu1 %1566, %v1570_v24  }
  0x97   : > { %v333_v25 = vpop.permute.xlu0 %332 }
  0x98   : > { %v340_v26 = vmul.f32 %v333_v25, %v1730_v2 }
  0x9a   : > { %v343_v27 = vsel %vm342_vm2, %v340_v26, 0.0 }
  0x9b   : > { %v338_v28 = vpop.permute.xlu0 %337  ;;  %v344_v30 = vrot.slane %v343_v27, 4 }
  0x9c   : > { %v341_v29 = vmul.f32 %v338_v28, %v1732_v3 }
  0x9d   : > { %v345_v32 = vadd.f32 %v344_v30, %v343_v27 }
  0x9e   : > { %v350_v31 = vsel %vm342_vm2, %v341_v29, 0.0 }
  0x9f   : > { %v351_v33 = vrot.slane %v350_v31, 4  ;;  %v346_v34 = vrot.slane %v345_v32, 2 }
  0xa1   : > { %v352_v35 = vadd.f32 %v351_v33, %v350_v31  ;;  %v347_v37 = vadd.f32 %v346_v34, %v345_v32 }
  0xa3   : > { %v353_v36 = vrot.slane %v352_v35, 2  ;;  %v348_v38 = vrot.slane %v347_v37, 1 }
  0xa5   : > { %v354_v39 = vadd.f32 %v353_v36, %v352_v35  ;;  %v349_v40 = vadd.f32 %v348_v38, %v347_v37 }
  0xa7   : > { %v355_v41 = vrot.slane %v354_v39, 1 }
  0xa9   : > { %v356_v44 = vadd.f32 %v355_v41, %v354_v39 }
  0xb3   : > { %v379_v42 = vpop.permute.xlu1 %378 }
  0xb4   : > { %v386_v43 = vmul.f32 %v379_v42, %v349_v40 }
  0xb6   : > { %389 = vst.msk [vmem:[#allocation3] sm:$0x1] %vm388_vm3, %v386_v43 }
  0xb7   : > { %v384_v45 = vpop.permute.xlu1 %383 }
  0xb8   : > { %v387_v46 = vmul.f32 %v384_v45, %v356_v44 }
  0xba   : > { %390 = vst.msk [vmem:[#allocation3 + $0x1] sm:$0x1] %vm388_vm3, %v387_v46 }
  0xbb PF: > { %s1417_s24 = sshll.u32 %s1712_s10, 4  ;;  %v1646_v47 = vmov 0.0   ;;  %vm1647_vm4 = vmmov 0   ;;  %v423_v50 = vpack.c.bf16 %v1732_v3, %v1730_v2  ;;  %vm440_vm5 = vcmask 261120   ;;  %s1385_s16 = sshll.u32 %s1712_s10, 3 }
  0xbc   : > { %1452 = vmatprep.subr.bf16.mxu1 %v1646_v47  ;;  %s393_s27 = scalar_lea.vmem %s1929_s3, %s1417_s24  ;;  %1456 = vmatprep.mubr.msk.bf16.mxu1 %vm1647_vm4, %v1646_v47  ;;  %s1756_s11 = scalar_lea.vmem %s1930_s4, %s1417_s24  ;;  %v424_v51 = vlaneseq  ;;  %vm508_vm6 = vcmask 130048   ;;  %v1799_v10 = vld [vmem:[%s1928_s2] ss:$0 sm:$0xff]  ;;  %vm604_vm7 = vcmask 64512   ;;  %v1805_v14 = vld [vmem:[%s1928_s2 + $0x1] ss:$0 sm:$0xff] }
  0xbd   : > { %v1571_v48 = vld [vmem:[%s393_s27 + $0x8] sm:$0xff]   ;;  %1466 = vmatprep.subr.bf16.mxu0 %v1646_v47  ;;  %1468 = vmatprep.mubr.msk.bf16.mxu0 %vm1647_vm4, %v1646_v47  ;;  %v1572_v49 = vld [vmem:[%s393_s27] sm:$0xff]   ;;  %s1761_s14 = scalar_lea.vmem %s1931_s5, %s1417_s24  ;;  %s421_s19 = scalar_lea.vmem %s1933_s7, %s1385_s16  ;;  %vm634_vm8 = vcmask 1043456   ;;  %vm1205_vm9 = vcmask 523264  }
  0xbe   : > { %1453 = vmatpush3.bf16.msra.mxu1 %v1571_v48  ;;  %v1771_v52 = vshrl.u32 %v424_v51, 7  ;;  %v1777_v54 = vld [vmem:[%s421_s19] sm:$0xff]  ;;  %s1648_s20 = smov 96   ;;  %s1649_s25 = smov 64  }
  0xbf   : > { %1454 = vmatprep.subr.bf16.mxu1 %v1646_v47  ;;  %s1650_s26 = smov 80   ;;  %s1651_s27 = smov 112  }
  0xc0   : > { %v426_v53 = vsub.s32 0, %v1771_v52  ;;  %s1652_s28 = smov 48   ;;  %s1420_s29 = sshll.u32 %s1712_s10, 5 }
  0xc1   : > { %s412_s13 = scalar_lea.vmem %s1932_s6, %s1420_s29  ;;  %p1544_p6 = scmp.eq.s32.totalorder %s1712_s10, 1 }
  0xc2   : > { %1455 = vmatpush3.bf16.msra.mxu1 %v1572_v49  ;;  %v427_v55 = vrot.slane %v1777_v54, %v426_v53 }
  0xc3   : > { %1460 = vmatprep.subr.bf16.mxu1 %v1646_v47 }
  0xc5   : > { %1457 = vmatmul.mubr.msk.bf16.vlgmr.msra.gmra.mxu1 %vm440_vm5, %v423_v50 }
  0xc6   : > { %1462 = vmatprep.mubr.msk.bf16.mxu1 %vm1647_vm4, %v1646_v47 }
 0x185   : > { %v478_v56 = vpop.f32.mrf.mxu1 }
 0x186   : > { %v479_v57 = vadd.f32 %v478_v56, %v427_v55 }
 0x187   : > { %v1458_v58 = vpop.f32.mrf.mxu1 }
 0x188   : > { %v1780_v59 = vpack.c.bf16 %v479_v57, %v479_v57  ;;  %v485_v4 = vmul.f32 0.25, %v479_v57 }
 0x189   : > { %v481_v60 = vpop.f32.mrf.mxu1 }
 0x18a   : > { %v482_v61 = vadd.f32 %v481_v60, %v427_v55  ;;  %506 = vrot.lane.b32.xlu0 %v1780_v59, %s1648_s20  ;;  %v501_v7 = vpack.c.bf16 %v485_v4, %v485_v4 }
 0x18b   : > { %v1459_v62 = vpop.f32.mrf.mxu1 }
 0x18c   : > { %v1783_v63 = vpack.c.bf16 %v482_v61, %v482_v61  ;;  %v486_v8 = vmul.f32 0.25, %v482_v61 }
 0x18e   : > { %556 = vrot.lane.b32.xlu0 %v1783_v63, %s1648_s20  ;;  %v502_v9 = vpack.c.bf16 %v486_v8, %v486_v8 }
 0x1fc   : > { %v507_v0 = vpop.permute.xlu0 %506 }
 0x1fd   : > { %v513_v1 = vsel %vm508_vm6, %v507_v0, 0 }
 0x1fe   : > { %1461 = vmatpush3.bf16.xpose.msra.mxu1 %v513_v1 }
 0x1ff   : > { %1472 = vmatprep.subr.bf16.mxu1 %v1646_v47 }
 0x200   : > { %v557_v5 = vpop.permute.xlu0 %556 }
 0x201   : > { %v562_v6 = vsel %vm508_vm6, %v557_v5, 0 }
 0x202   : > { %1467 = vmatpush3.bf16.xpose.msra.mxu0 %v562_v6 }
 0x203   : > { %1478 = vmatprep.subr.bf16.mxu0 %v1646_v47 }
 0x205   : > { %1463 = vmatmul.mubr.msk.bf16.vlgmr.msra.gmra.mxu1 %vm508_vm6, %v501_v7 }
 0x206   : > { %1474 = vmatprep.mubr.msk.bf16.mxu1 %vm1647_vm4, %v1646_v47 }
 0x209   : > { %1469 = vmatmul.mubr.msk.bf16.vlgmr.msra.gmra.mxu0 %vm508_vm6, %v502_v9 }
 0x20a   : > { %1480 = vmatprep.mubr.msk.bf16.mxu0 %vm1647_vm4, %v1646_v47 }
 0x2c5   : > { %v549_v11 = vpop.f32.mrf.mxu1 }
 0x2c6   : > { %v550_v12 = vadd.f32 %v1799_v10, %v549_v11 }
 0x2c7   : > { %v1464_v13 = vpop.f32.mrf.mxu1 }
 0x2c8   : > { %v605_v15 = vsel %vm604_vm7, %v550_v12, -inf }
 0x2c9   : > { %v598_v16 = vpop.f32.mrf.mxu0  ;;  %606 = vmax.xlane.f32.xlu1 %v605_v15  ;;  %v552_v17 = vpop.f32.mrf.mxu1 }
 0x2ca   : > { %v599_v18 = vadd.f32 %v1805_v14, %v598_v16 }
 0x2cb   : > { %v1465_v19 = vpop.f32.mrf.mxu1  ;;  %v1470_v20 = vpop.f32.mrf.mxu0 }
 0x2cc   : > { %v608_v21 = vsel %vm604_vm7, %v599_v18, -inf }
 0x2cd   : > { %v601_v22 = vpop.f32.mrf.mxu0  ;;  %609 = vmax.xlane.f32.xlu1 %v608_v21 }
 0x2cf   : > { %v1471_v23 = vpop.f32.mrf.mxu0 }
 0x2de   : > { %629 = vrot.lane.b32.xlu1 %v1780_v59, %s1649_s25 }
 0x2e2   : > { %678 = vrot.lane.b32.xlu1 %v1783_v63, %s1649_s25 }
 0x2e6   : > { %730 = vrot.lane.b32.xlu1 %v1780_v59, %s1650_s26 }
 0x352   : > { %v607_v24 = vpop.xlane.xlu1 %606 }
 0x353   : > { %v611_v25 = vsub.f32 %v550_v12, %v607_v24 }
 0x355   : > { %v613_v26 = vmul.f32 1.442695, %v611_v25 }
 0x356   : > { %v610_v27 = vpop.xlane.xlu1 %609 }
 0x357   : > { %1581 = vpow2.f32 %v613_v26  ;;  %v612_v28 = vsub.f32 %v599_v18, %v610_v27 }
 0x359   : > { %v615_v29 = vmul.f32 1.442695, %v612_v28 }
 0x35a   : > { %v630_v30 = vpop.permute.xlu1 %629 }
 0x35b   : > { %1583 = vpow2.f32 %v615_v29  ;;  %v636_v31 = vsel %vm634_vm8, %v630_v30, 0 }
 0x35c   : > { %1473 = vmatpush3.bf16.msra.mxu1 %v636_v31 }
 0x35d   : > { %1484 = vmatprep.subr.bf16.mxu1 %v1646_v47 }
 0x35e   : > { %v679_v32 = vpop.permute.xlu1 %678 }
 0x35f   : > { %v684_v33 = vsel %vm634_vm8, %v679_v32, 0 }
 0x360   : > { %1479 = vmatpush3.bf16.msra.mxu0 %v684_v33 }
 0x361   : > { %1490 = vmatprep.subr.bf16.mxu0 %v1646_v47 }
 0x362   : > { %v731_v38 = vpop.permute.xlu1 %730 }
 0x363   : > { %v736_v45 = vsel %vm508_vm6, %v731_v38, 0 }
 0x364   : > { %v1582_v34 = vpop.eup %1581 }
 0x365   : > { %v617_v35 = vsel %vm604_vm7, %v1582_v34, 0.0 }
 0x366   : > { %618 = vadd.xlane.f32.xlu0 %v617_v35 }
 0x368   : > { %v1584_v36 = vpop.eup %1583 }
 0x369   : > { %v620_v37 = vsel %vm604_vm7, %v1584_v36, 0.0 }
 0x36a   : > { %621 = vadd.xlane.f32.xlu1 %v620_v37  ;;  %v1574_v37 = vld [vmem:[%s1756_s11 + $0x8] sm:$0xff]  }
 0x37b   : > { %781 = vrot.lane.b32.xlu1 %v1783_v63, %s1650_s26 }
 0x37c   : > { %728 = vrot.lane.b32.xlu0 %v501_v7, %s1651_s27 }
 0x37f   : > { %779 = vrot.lane.b32.xlu1 %v502_v9, %s1651_s27 }
 0x3ef   : > { %v619_v39 = vpop.xlane.xlu0 %618 }
 0x3f0   : > { %1585 = vrcp.f32 %v619_v39 }
 0x3f3   : > { %v622_v40 = vpop.xlane.xlu1 %621  ;;  %v729_v51 = vpop.permute.xlu0 %728 }
 0x3f4   : > { %1587 = vrcp.f32 %v622_v40 }
 0x3f7   : > { %v782_v48 = vpop.permute.xlu1 %781 }
 0x3f8   : > { %v787_v50 = vsel %vm508_vm6, %v782_v48, 0 }
 0x3fb   : > { %v780_v53 = vpop.permute.xlu1 %779 }
 0x3fd   : > { %v1586_v41 = vpop.eup %1585 }
 0x3fe   : > { %v625_v42 = vmul.f32 %v1586_v41, %v1582_v34 }
 0x400   : > { %v627_v43 = vpack.c.bf16 %v625_v42, %v625_v42 }
 0x401   : > { %v1588_v44 = vpop.eup %1587 }
 0x402   : > { %1475 = vmatmul.mubr.msk.bf16.vlgmr.msra.gmra.mxu1 %vm604_vm7, %v627_v43  ;;  %v626_v46 = vmul.f32 %v1588_v44, %v1584_v36  ;;  %v1573_v36 = vld [vmem:[%s1756_s11] sm:$0xff]  }
 0x403   : > { %1485 = vmatpush3.bf16.xpose.msra.mxu1 %v736_v45  ;;  %1486 = vmatprep.mubr.msk.bf16.mxu1 %vm1647_vm4, %v1646_v47 }
 0x404   : > { %v628_v49 = vpack.c.bf16 %v626_v46, %v626_v46  ;;  %1496 = vmatprep.subr.bf16.mxu1 %v1646_v47 }
 0x406   : > { %1481 = vmatmul.mubr.msk.bf16.vlgmr.msra.gmra.mxu0 %vm604_vm7, %v628_v49 }
 0x407   : > { %1491 = vmatpush3.bf16.xpose.msra.mxu0 %v787_v50  ;;  %1492 = vmatprep.mubr.msk.bf16.mxu0 %vm1647_vm4, %v1646_v47 }
 0x408   : > { %1502 = vmatprep.subr.bf16.mxu0 %v1646_v47 }
 0x40a   : > { %1487 = vmatmul.mubr.msk.bf16.vlgmr.msra.gmra.mxu1 %vm508_vm6, %v729_v51 }
 0x40b   : > { %1498 = vmatprep.mubr.msk.bf16.mxu1 %vm1647_vm4, %v1646_v47 }
 0x40e   : > { %1493 = vmatmul.mubr.msk.bf16.vlgmr.msra.gmra.mxu0 %vm508_vm6, %v780_v53  ;;  %v1052_v53 = vsub.s32 1, %v1771_v52 }
 0x40f   : > { %1504 = vmatprep.mubr.msk.bf16.mxu0 %vm1647_vm4, %v1646_v47 }
 0x4c2   : > { %v1836_v55 = vpop.f32.mrf.mxu1 }
 0x4c4   : > { %v1476_v56 = vpop.f32.mrf.mxu1 }
 0x4c6   : > { %v675_v57 = vpop.f32.mrf.mxu1  ;;  %v1838_v58 = vpop.f32.mrf.mxu0 }
 0x4c7   : > { %v726_v60 = vpack.c.bf16 %v1838_v58, %v1836_v55  ;;  %v1053_v55 = vrot.slane %v1777_v54, %v1052_v53 }
 0x4c8   : > { %v1477_v61 = vpop.f32.mrf.mxu1  ;;  %v1482_v62 = vpop.f32.mrf.mxu0 }
 0x4ca   : > { %v723_v0 = vpop.f32.mrf.mxu0  ;;  %v772_v1 = vpop.f32.mrf.mxu1 }
 0x4cb   : > { %v773_v4 = vadd.f32 %v1799_v10, %v772_v1 }
 0x4cc   : > { %v1483_v5 = vpop.f32.mrf.mxu0  ;;  %v1488_v6 = vpop.f32.mrf.mxu1 }
 0x4cd   : > { %v829_v7 = vsel %vm604_vm7, %v773_v4, -inf }
 0x4ce   : > { %v823_v8 = vpop.f32.mrf.mxu0  ;;  %830 = vmax.xlane.f32.xlu1 %v829_v7  ;;  %v775_v9 = vpop.f32.mrf.mxu1 }
 0x4cf   : > { %v824_v11 = vadd.f32 %v1805_v14, %v823_v8 }
 0x4d0   : > { %v1489_v12 = vpop.f32.mrf.mxu1  ;;  %v1494_v13 = vpop.f32.mrf.mxu0 }
 0x4d1   : > { %v832_v15 = vsel %vm604_vm7, %v824_v11, -inf }
 0x4d2   : > { %833 = vmax.xlane.f32.xlu0 %v832_v15  ;;  %v826_v16 = vpop.f32.mrf.mxu0 }
 0x4d4   : > { %v1495_v17 = vpop.f32.mrf.mxu0 }
 0x4e8   : > { %901 = vrot.lane.b32.xlu0 %v1783_v63, %s1652_s28 }
 0x557   : > { %v831_v10 = vpop.xlane.xlu1 %830 }
 0x558   : > { %v835_v18 = vsub.f32 %v773_v4, %v831_v10 }
 0x55a   : > { %v837_v19 = vmul.f32 1.442695, %v835_v18  ;;  %v1575_v18 = vld [vmem:[%s1761_s14 + $0x8] sm:$0xff]  }
 0x55b   : > { %v834_v20 = vpop.xlane.xlu0 %833 }
 0x55c   : > { %1589 = vpow2.f32 %v837_v19  ;;  %v836_v21 = vsub.f32 %v824_v11, %v834_v20 }
 0x55e   : > { %v839_v22 = vmul.f32 1.442695, %v836_v21 }
 0x55f   : > { %v902_v23 = vpop.permute.xlu0 %901 }
 0x560   : > { %1591 = vpow2.f32 %v839_v22  ;;  %v907_v14 = vsel %vm634_vm8, %v902_v23, 0 }
 0x561   : > { %1503 = vmatpush3.bf16.msra.mxu0 %v907_v14 }
 0x562   : > { %1514 = vmatprep.subr.bf16.mxu0 %v1646_v47 }
 0x569   : > { %v1590_v24 = vpop.eup %1589 }
 0x56a   : > { %v841_v25 = vsel %vm604_vm7, %v1590_v24, 0.0 }
 0x56b   : > { %842 = vadd.xlane.f32.xlu1 %v841_v25 }
 0x56d   : > { %v1592_v26 = vpop.eup %1591 }
 0x56e   : > { %v844_v63 = vsel %vm604_vm7, %v1592_v26, 0.0 }
 0x56f   : > { %845 = vadd.xlane.f32.xlu1 %v844_v63 }
 0x580   : > { %853 = vrot.lane.b32.xlu1 %v1780_v59, %s1652_s28 }
 0x5f4   : > { %v843_v27 = vpop.xlane.xlu1 %842 }
 0x5f5   : > { %1593 = vrcp.f32 %v843_v27  ;;  %v1093_v27 = vsub.s32 3, %v1771_v52 }
 0x5f8   : > { %v846_v28 = vpop.xlane.xlu1 %845 }
 0x5f9   : > { %1595 = vrcp.f32 %v846_v28 }
 0x5fc   : > { %v854_v29 = vpop.permute.xlu1 %853 }
 0x5fd   : > { %v859_v30 = vsel %vm634_vm8, %v854_v29, 0 }
 0x5fe   : > { %1497 = vmatpush3.bf16.msra.mxu1 %v859_v30 }
 0x5ff   : > { %1508 = vmatprep.subr.bf16.mxu1 %v1646_v47 }
 0x602   : > { %v1594_v31 = vpop.eup %1593 }
 0x603   : > { %v849_v32 = vmul.f32 %v1594_v31, %v1590_v24  ;;  %v1087_v24 = vsub.s32 2, %v1771_v52  ;;  %v1094_v31 = vrot.slane %v1777_v54, %v1093_v27 }
 0x605   : > { %v851_v33 = vpack.c.bf16 %v849_v32, %v849_v32  ;;  %v1088_v63 = vrot.slane %v1777_v54, %v1087_v24 }
 0x606   : > { %v1596_v34 = vpop.eup %1595 }
 0x607   : > { %1499 = vmatmul.mubr.msk.bf16.vlgmr.msra.gmra.mxu1 %vm604_vm7, %v851_v33  ;;  %v850_v35 = vmul.f32 %v1596_v34, %v1592_v26 }
 0x608   : > { %1510 = vmatprep.mubr.msk.bf16.mxu1 %vm1647_vm4, %v1646_v47  ;;  %1509 = vmatpush3.bf16.msra.mxu1 %v1574_v37  ;;  %v1579_v37 = vld [vmem:[%s412_s13 + $0x8] sm:$0xff]  }
 0x609   : > { %v852_v59 = vpack.c.bf16 %v850_v35, %v850_v35  ;;  %1520 = vmatprep.subr.bf16.mxu1 %v1646_v47 }
 0x60b   : > { %1505 = vmatmul.mubr.msk.bf16.vlgmr.msra.gmra.mxu0 %vm604_vm7, %v852_v59  ;;  %v1578_v59 = vld [vmem:[%s412_s13 + $0x10] sm:$0xff]  }
 0x60c   : > { %1515 = vmatpush3.bf16.msra.mxu0 %v1573_v36  ;;  %1516 = vmatprep.mubr.msk.bf16.mxu0 %vm1647_vm4, %v1646_v47  ;;  %v1577_v36 = vld [vmem:[%s412_s13 + $0x18] sm:$0xff]  }
 0x60d   : > { %1528 = vmatprep.subr.bf16.mxu0 %v1646_v47 }
 0x613   : > { %1517 = vmatmul.mubr.msk.bf16.vlgmr.msra.gmra.mxu0 %vm508_vm6, %v726_v60 }
 0x614   : > { %1536 = vmatprep.mubr.msk.bf16.mxu0 %vm1647_vm4, %v1646_v47  ;;  %1529 = vmatpush3.bf16.msra.mxu0 %v1577_v36 }
 0x615   : > { %1530 = vmatprep.subr.bf16.mxu0 %v1646_v47 }
 0x618   : > { %1531 = vmatpush3.bf16.msra.mxu0 %v1578_v59 }
 0x619   : > { %1532 = vmatprep.subr.bf16.mxu0 %v1646_v47 }
 0x61c   : > { %1533 = vmatpush3.bf16.msra.mxu0 %v1579_v37 }
 0x61d   : > { %1534 = vmatprep.subr.bf16.mxu0 %v1646_v47 }
 0x6c7   : > { %v895_v38 = vpop.f32.mrf.mxu1 }
 0x6c9   : > { %v1500_v39 = vpop.f32.mrf.mxu1 }
 0x6ca   : > { %v1100_v39 = vsub.s32 4, %v1771_v52 }
 0x6cb   : > { %v898_v40 = vpop.f32.mrf.mxu1  ;;  %v943_v41 = vpop.f32.mrf.mxu0 }
 0x6cc   : > { %v949_v42 = vpack.c.bf16 %v943_v41, %v895_v38  ;;  %v1580_v38 = vld [vmem:[%s412_s13] sm:$0xff]   ;;  %v1101_v40 = vrot.slane %v1777_v54, %v1100_v39 }
 0x6cd   : > { %v1501_v43 = vpop.f32.mrf.mxu1  ;;  %v1506_v44 = vpop.f32.mrf.mxu0  ;;  %1535 = vmatpush3.bf16.msra.mxu0 %v1580_v38 }
 0x6ce   : > { %1511 = vmatmul.mubr.msk.bf16.vlgmr.msra.gmra.mxu1 %vm508_vm6, %v949_v42 }
 0x6cf   : > { %v946_v45 = vpop.f32.mrf.mxu0  ;;  %1524 = vmatprep.mubr.msk.bf16.mxu1 %vm1647_vm4, %v1646_v47  ;;  %1521 = vmatpush3.bf16.msra.mxu1 %v1575_v18 }
 0x6d0   : > { %1522 = vmatprep.subr.bf16.mxu1 %v1646_v47 }
 0x6d1   : > { %v1507_v46 = vpop.f32.mrf.mxu0 }
 0x6d3   : > { %v1043_v48 = vpop.f32.mrf.mxu0 }
 0x6d5   : > { %v1518_v49 = vpop.f32.mrf.mxu0 }
 0x6d7   : > { %v1046_v50 = vpop.f32.mrf.mxu0 }
 0x6d9   : > { %v1519_v51 = vpop.f32.mrf.mxu0 }
 0x78e   : > { %v993_v56 = vpop.f32.mrf.mxu1 }
 0x78f   : > { %v1044_v57 = vadd.f32 %v1043_v48, %v993_v56 }
 0x790   : > { %v1512_v58 = vpop.f32.mrf.mxu1 }
 0x791   : > { %v1054_v60 = vadd.f32 %v1053_v55, %v1044_v57 }
 0x792   : > { %v996_v61 = vpop.f32.mrf.mxu1 }
 0x793   : > { %v1047_v62 = vadd.f32 %v1046_v50, %v996_v61  ;;  %v1056_v0 = vadd.f32 %v1054_v60, %v1730_v2 }
 0x794   : > { %v1513_v1 = vpop.f32.mrf.mxu1 }
 0x795   : > { %v1055_v4 = vadd.f32 %v1053_v55, %v1047_v62  ;;  %v1058_v5 = vsel %vm440_vm5, %v1056_v0, 0.0 }
 0x796   : > { %1059 = vadd.xlane.f32.xlu1 %v1058_v5 }
 0x797   : > { %v1057_v6 = vadd.f32 %v1055_v4, %v1732_v3  ;;  %v1576_v3 = vld [vmem:[%s1761_s14] sm:$0xff]   ;;  %s1653_s14 = smov [#allocation3]  }
 0x798   : > { %1523 = vmatpush3.bf16.msra.mxu1 %v1576_v3  ;;  %s1308_s16 = sshll.u32 %s1653_s14, 4  ;;  %s1309_s16 = int_to_ptr.vmem [resolvable:$true] %s1308_s16 }
 0x799   : > { %v1061_v7 = vsel %vm440_vm5, %v1057_v6, 0.0  ;;  %s1609_s17 = scalar_lea.vmem %s1309_s16, 32  ;;  %p1616_p10 = scmp.lt.s32.totalorder %s1309_s16, %s1309_s16 }
 0x79a   : > { %1062 = vadd.xlane.f32.xlu0 %v1061_v7  ;;  %p1610_p7 = scmp.ne.s32.totalorder %s1309_s16, %s1609_s17  ;;  %p1617_p11 = scmp.lt.s32.totalorder %s1609_s17, %s1609_s17 }
 0x79c   : > { %p1611_p8 = pnand %p1610_p7, %p1544_p6  ;;  %p1618_p12 = por %p1617_p11, %p1616_p10 }
 0x79e   : > { %p1612_p9 = pneg %p1611_p8 }
 0x7a0   : > { %p1619_p13 = pnand %p1618_p12, %p1612_p9 }
 0x81f   : > { %v1060_v8 = vpop.xlane.xlu1 %1059 }
 0x820   : > { %v1065_v9 = vmul.f32 0.03125, %v1060_v8  ;;  %v1179_v8 = vsub.s32 5, %v1771_v52 }
 0x822   : > { %v1067_v11 = vsub.f32 %v1056_v0, %v1065_v9  ;;  %v1180_v9 = vrot.slane %v1777_v54, %v1179_v8 }
 0x823   : > { %v1063_v12 = vpop.xlane.xlu0 %1062 }
 0x824   : > { %v1066_v13 = vmul.f32 0.03125, %v1063_v12  ;;  %v1069_v15 = vmul.f32 %v1067_v11, %v1067_v11 }
 0x826   : > { %v1068_v16 = vsub.f32 %v1057_v6, %v1066_v13  ;;  %v1071_v2 = vsel %vm440_vm5, %v1069_v15, 0.0 }
 0x827   : > { %1072 = vadd.xlane.f32.xlu1 %v1071_v2 }
 0x828   : > { %v1070_v17 = vmul.f32 %v1068_v16, %v1068_v16 }
 0x82a   : > { %v1074_v10 = vsel %vm440_vm5, %v1070_v17, 0.0 }
 0x82b   : > { %1075 = vadd.xlane.f32.xlu0 %v1074_v10 }
 0x8b0   : > { %v1073_v19 = vpop.xlane.xlu1 %1072 }
 0x8b1   : > { %v1077_v20 = vmul.f32 0.03125, %v1073_v19 }
 0x8b3   : > { %v1079_v21 = vadd.f32 1e-12, %v1077_v20 }
 0x8b4   : > { %v1076_v22 = vpop.xlane.xlu0 %1075 }
 0x8b5   : > { %1597 = vrsqrt.f32 %v1079_v21  ;;  %v1078_v23 = vmul.f32 0.03125, %v1076_v22 }
 0x8b7   : > { %v1080_v14 = vadd.f32 1e-12, %v1078_v23 }
 0x8b9   : > { %1599 = vrsqrt.f32 %v1080_v14 }
 0x8c2   : > { %v1598_v25 = vpop.eup %1597 }
 0x8c3   : > { %v1083_v26 = vmul.f32 %v1598_v25, %v1067_v11 }
 0x8c5   : > { %v1089_v30 = vmul.f32 %v1088_v63, %v1083_v26 }
 0x8c6   : > { %v1600_v28 = vpop.eup %1599 }
 0x8c7   : > { %v1084_v29 = vmul.f32 %v1600_v28, %v1068_v16  ;;  %v1095_v33 = vadd.f32 %v1094_v31, %v1089_v30 }
 0x8c9   : > { %v1090_v32 = vmul.f32 %v1088_v63, %v1084_v29 }
 0x8cb   : > { %v1096_v34 = vadd.f32 %v1094_v31, %v1090_v32 }
 0x8cd   : > { %v1097_v35 = vpack.c.bf16 %v1096_v34, %v1095_v33 }
 0x8cf   : > { %1525 = vmatmul.mubr.msk.bf16.vlgmr.msra.gmra.mxu1 %vm440_vm5, %v1097_v35 }
 0x98f   : > { %v1151_v41 = vpop.f32.mrf.mxu1 }
 0x990   : > { %v1152_v42 = vadd.f32 %v1151_v41, %v1101_v40 }
 0x991   : > { %v1526_v43 = vpop.f32.mrf.mxu1 }
 0x992   : > { %v1158_v44 = vmul.f32 %v1152_v42, %v1152_v42 }
 0x993   : > { %v1154_v45 = vpop.f32.mrf.mxu1 }
 0x994   : > { %v1160_v46 = vmul.f32 %v1158_v44, %v1152_v42  ;;  %v1155_v48 = vadd.f32 %v1154_v45, %v1101_v40 }
 0x995   : > { %v1527_v49 = vpop.f32.mrf.mxu1 }
 0x996   : > { %v1162_v50 = vmul.f32 0.044715, %v1160_v46  ;;  %v1159_v51 = vmul.f32 %v1155_v48, %v1155_v48 }
 0x998   : > { %v1164_v53 = vadd.f32 %v1162_v50, %v1152_v42  ;;  %v1161_v55 = vmul.f32 %v1159_v51, %v1155_v48 }
 0x99a   : > { %v1166_v56 = vmul.f32 0.7978846, %v1164_v53  ;;  %v1163_v47 = vmul.f32 0.044715, %v1161_v55 }
 0x99c   : > { %1601 = vtanh.f32 %v1166_v56  ;;  %v1165_v57 = vadd.f32 %v1163_v47, %v1155_v48 }
 0x99e   : > { %v1167_v58 = vmul.f32 0.7978846, %v1165_v57 }
 0x9a0   : > { %1603 = vtanh.f32 %v1167_v58 }
 0x9a9   : > { %v1602_v60 = vpop.eup %1601 }
 0x9aa   : > { %v1170_v61 = vadd.f32 1.0, %v1602_v60 }
 0x9ac   : > { %v1172_v0 = vmul.f32 0.5, %v1170_v61 }
 0x9ad   : > { %v1604_v62 = vpop.eup %1603 }
 0x9ae   : > { %v1171_v1 = vadd.f32 1.0, %v1604_v62  ;;  %v1174_v5 = vmul.f32 %v1172_v0, %v1152_v42 }
 0x9b0   : > { %v1173_v4 = vmul.f32 0.5, %v1171_v1 }
 0x9b2   : > { %v1175_v6 = vmul.f32 %v1173_v4, %v1155_v48 }
 0x9b4   : > { %v1176_v7 = vpack.c.bf16 %v1175_v6, %v1174_v5 }
 0x9b6   : > { %1537 = vmatmul.mubr.msk.bf16.vlgmr.msra.gmra.mxu0 %vm1205_vm9, %v1176_v7 }
 0xa76   : > { %v1243_v11 = vpop.f32.mrf.mxu0 }
 0xa77   : > { %v1244_v12 = vadd.f32 %v1243_v11, %v1180_v9 }
 0xa78   : > { %v1538_v13 = vpop.f32.mrf.mxu0 }
 0xa79   : > { %v1250_v15 = vadd.f32 %v1244_v12, %v1095_v33 }
 0xa7a   : > { %v1246_v16 = vpop.f32.mrf.mxu0 }
 0xa7b   : > { %v1247_v2 = vadd.f32 %v1246_v16, %v1180_v9  ;;  %v1252_v17 = vsel %vm440_vm5, %v1250_v15, 0.0 }
 0xa7c   : > { %1253 = vadd.xlane.f32.xlu1 %v1252_v17  ;;  %v1539_v10 = vpop.f32.mrf.mxu0 }
 0xa7d   : > { %v1251_v18 = vadd.f32 %v1247_v2, %v1096_v34 }
 0xa7f   : > { %v1255_v3 = vsel %vm440_vm5, %v1251_v18, 0.0 }
 0xa80   : > { %1256 = vadd.xlane.f32.xlu0 %v1255_v3 }
 0xb05   : > { %v1254_v19 = vpop.xlane.xlu1 %1253 }
 0xb06   : > { %v1258_v20 = vmul.f32 0.03125, %v1254_v19 }
 0xb08   : > { %v1260_v21 = vsub.f32 %v1250_v15, %v1258_v20 }
 0xb09   : > { %v1257_v22 = vpop.xlane.xlu0 %1256 }
 0xb0a   : > { %v1259_v23 = vmul.f32 0.03125, %v1257_v22  ;;  %v1262_v14 = vmul.f32 %v1260_v21, %v1260_v21 }
 0xb0c   : > { %v1261_v24 = vsub.f32 %v1251_v18, %v1259_v23  ;;  %v1264_v25 = vsel %vm440_vm5, %v1262_v14, 0.0 }
 0xb0d   : > { %1265 = vadd.xlane.f32.xlu1 %v1264_v25 }
 0xb0e   : > { %v1263_v26 = vmul.f32 %v1261_v24, %v1261_v24 }
 0xb10   : > { %v1267_v63 = vsel %vm440_vm5, %v1263_v26, 0.0 }
 0xb11   : > { %1268 = vadd.xlane.f32.xlu0 %v1267_v63 }
 0xb12   : > { %1622 = shalt.err (!%p1619_p13)
}
 0xb13   : > { %s1654_s18 = smov 16   ;;  %s1655_s19 = smov 1   ;;  %v1280_v33 = vsub.s32 6, %v1771_v52  ;;  %v1286_v34 = vsub.s32 7, %v1771_v52 }
 0xb14   : > { %1541 = dma.vmem_to_hbm [thread:$0]  (%p1544_p6), %s1309_s16, 32, %s1935_s9, [#allocation4], %s1654_s18, %s1654_s18, %s1655_s19  }
 0xb15   : > { %v1281_v35 = vrot.slane %v1777_v54, %v1280_v33  ;;  %v1287_v59 = vrot.slane %v1777_v54, %v1286_v34 }
 0xb96   : > { %v1266_v27 = vpop.xlane.xlu1 %1265 }
 0xb97   : > { %v1270_v28 = vmul.f32 0.03125, %v1266_v27 }
 0xb99   : > { %v1272_v29 = vadd.f32 1e-12, %v1270_v28 }
 0xb9a   : > { %v1269_v30 = vpop.xlane.xlu0 %1268 }
 0xb9b   : > { %1605 = vrsqrt.f32 %v1272_v29  ;;  %v1271_v31 = vmul.f32 0.03125, %v1269_v30 }
 0xb9d   : > { %v1273_v32 = vadd.f32 1e-12, %v1271_v31 }
 0xb9f   : > { %1607 = vrsqrt.f32 %v1273_v32 }
 0xba8   : > { %v1606_v36 = vpop.eup %1605 }
 0xba9   : > { %v1276_v37 = vmul.f32 %v1606_v36, %v1260_v21 }
 0xbab   : > { %v1282_v38 = vmul.f32 %v1281_v35, %v1276_v37 }
 0xbac   : > { %v1608_v39 = vpop.eup %1607 }
 0xbad   : > { %v1288_v40 = vadd.f32 %v1287_v59, %v1282_v38  ;;  %v1277_v41 = vmul.f32 %v1608_v39, %v1261_v24 }
 0xbaf   : > { %1290 = vst.msk [vmem:[#allocation2] sm:$0xff] %vm440_vm5, %v1288_v40  ;;  %1292 = vst.msk [vmem:[%s1721_s15] sm:$0xff] %vm440_vm5, %v1288_v40  ;;  %v1283_v42 = vmul.f32 %v1281_v35, %v1277_v41 }
 0xbb1   : > { %v1289_v43 = vadd.f32 %v1287_v59, %v1283_v42 }
 0xbb3   : > { %1291 = vst.msk [vmem:[#allocation2 + $0x8] sm:$0xff] %vm440_vm5, %v1289_v43  ;;  %1293 = vst.msk [vmem:[%s1721_s15 + $0x8] sm:$0xff] %vm440_vm5, %v1289_v43 }
 0xbb4   : > { %1638 = dma.done.wait (%p1544_p6), [#allocation4], 32  }
 0xbb5   : > { %1640 = vsyncadd (%p1544_p6), [#allocation4], 4294967264 }
 0xbb6 PF: > { %s21_s30 = sadd.s32 1, %s1643_s30  }
 0xbb7   : > { %p18_p0 = scmp.ge.s32.totalorder %s21_s30, 4  }
 0xbb9   :  { %20 = sbr.rel (!%p18_p0) target bundleno = 1 (0x1), region = 101 }
 0xbbe   :  { %1332 = vsyncpa [#allocation4], 1 }
 0xbbf   :  { %1334 = vsyncpa [#allocation4 + $0x1], 1 }

</bundles_post_ra>
